<compile_context>
chip_gen: v5e
topology: v5e:2x2
jax: 0.10.0
libtpu: 0.0.40
codegen_flags: <defaults>
</compile_context>

<pallas_src>
import jax
import jax.numpy as jnp
from jax.experimental import pallas as pl
from jax.experimental.pallas import tpu as pltpu

_MIB = 1024 * 1024
_LANE = 128


def _cdiv(a: int, b: int) -> int:
    return -(-a // b)


def _tpu_vmem_capacity_bytes() -> int:
    """Physical per-core VMEM; 128 MiB fallback if the query is unavailable."""
    try:
        return int(pltpu.get_tpu_info().vmem_capacity_bytes)
    except Exception:
        return 128 * _MIB


def _choose_blocks(rows: int, hw: int, itemsize: int):
    """Pick (block_rows, block_lanes, sublane_pack, vmem_bytes) for the grid."""
    sub = (8 * 4) // itemsize          # sublane packing: 8 f32, 16 bf16, 32 int8
    vmem = _tpu_vmem_capacity_bytes()
    is_v7x = vmem <= 64 * _MIB
    # v7x: bigger blocks to amortize ~0.35us/step against ~3.2 TB/s HBM.
    target = 8 * _MIB if is_v7x else 4 * _MIB

    # Lane (last-dim) block: full H*W when a sublane-group row fits the target,
    # else a multiple of 128 (keeps the (8,128) constraint and unmasked stores
    # everywhere except the boundary block).
    if sub * hw * itemsize <= target or hw <= _LANE:
        bc = hw   # TODO(synk): hw not a multiple of 128 -> masked stores; pad for prod shapes like 7x7.
    else:
        bc = max(_LANE, (target // (sub * itemsize)) // _LANE * _LANE)
        bc = min(bc, (hw // _LANE) * _LANE)

    # Row (sublane) block: as many sublane-aligned rows as fit in the target.
    br = max(sub, (target // (bc * itemsize)) // sub * sub)
    br = min(br, rows)

    # v7x megacore: guarantee >= 2 blocks when possible so both TCs stream.
    if is_v7x and _cdiv(rows, br) * _cdiv(hw, bc) == 1 and rows >= 2 * sub:
        br = _cdiv(_cdiv(rows, 2), sub) * sub

    return br, bc, sub, vmem


def _make_scale_kernel(block_rows: int, sub: int, scale_resident: bool):
    if scale_resident:
        def kernel(x_ref, s_ref, o_ref):
            # Scale is resident in VMEM across the whole grid; slice this row
            # block's scalars out of it (no per-step small DMA).
            r0 = pl.multiple_of(pl.program_id(0) * block_rows, sub)
            o_ref[...] = x_ref[...] * s_ref[pl.ds(r0, block_rows), :]
    else:
        def kernel(x_ref, s_ref, o_ref):
            o_ref[...] = x_ref[...] * s_ref[...]
    return kernel


def scale_layer(x_nchw: jax.Array, scale_c11: jax.Array) -> jax.Array:
    """Computes x * scale with per-channel (C,1,1) broadcasting over NCHW."""
    N, C, H, W = x_nchw.shape
    rows, hw = N * C, H * W
    itemsize = jnp.dtype(x_nchw.dtype).itemsize

    x2 = x_nchw.reshape(rows, hw)
    # One scalar per flattened row (a few KiB; free vs. HBM traffic).
    # TODO(synk): scale cast to x.dtype; PyTorch promotes to f32 for bf16 inputs.
    s2 = jnp.tile(scale_c11.reshape(C, 1).astype(x_nchw.dtype), (N, 1))

    br, bc, sub, vmem = _choose_blocks(rows, hw, itemsize)
    nr, nc = _cdiv(rows, br), _cdiv(hw, bc)
    rows_pad = nr * br

    # Keep the scale resident in VMEM across the grid unless N*C is so large
    # that its lane-padded footprint (rows x 128 lanes) stops being negligible.
    scale_resident = rows_pad * _LANE * itemsize <= 2 * _MIB
    if scale_resident:
        if rows_pad > rows:
            s2 = jnp.pad(s2, ((0, rows_pad - rows), (0, 0)))  # pad so in-kernel ds() stays in bounds
        s_spec = pl.BlockSpec((rows_pad, 1), lambda i, j: (0, 0))
        scale_buf_bytes = 2 * rows_pad * _LANE * itemsize
    else:
        s_spec = pl.BlockSpec((br, 1), lambda i, j: (i, 0))
        scale_buf_bytes = 2 * br * _LANE * itemsize

    # Explicit scoped-VMEM budget: double-buffered in + out blocks + scale +
    # slack; the default (16/32 MiB) would reject the larger blocks.
    block_bytes = br * bc * itemsize
    vmem_limit = 4 * block_bytes + scale_buf_bytes + 2 * _MIB
    vmem_limit = int(min(max(vmem_limit, 16 * _MIB), (vmem * 3) // 4))

    out = pl.pallas_call(
        _make_scale_kernel(br, sub, scale_resident),
        out_shape=jax.ShapeDtypeStruct((rows, hw), x_nchw.dtype),
        grid_spec=pl.GridSpec(
            grid=(nr, nc),
            in_specs=[
                pl.BlockSpec((br, bc), lambda i, j: (i, j)),
                s_spec,
            ],
            out_specs=pl.BlockSpec((br, bc), lambda i, j: (i, j)),
        ),
        compiler_params=pltpu.CompilerParams(
            dimension_semantics=("parallel", "parallel"),  # v7x TCs shard blocks
            vmem_limit_bytes=vmem_limit,
        ),
    )(x2, s2)
    return out.reshape(N, C, H, W)


if __name__ == "__main__":
    key = jax.random.PRNGKey(0)
    N, C, H, W = 2, 4, 16, 16

    x = jax.random.normal(key, (N, C, H, W), dtype=jnp.float32)

    # ScaleLayer.__init__: scale = FloatTensor(shape).fill_(init_value),
    # with shape = (C, 1, 1) for per-channel scaling, init_value = 0.001.
    init_value = 0.001
    scale = jnp.full((C, 1, 1), init_value, dtype=jnp.float32)

    y = scale_layer(x, scale)
    jax.block_until_ready(y)

    # Correctness check against plain-JAX broadcasting semantics.
    y_ref = x * scale[None, :, :, :]
    assert y.shape == x.shape
    assert jnp.allclose(y, y_ref, atol=1e-6, rtol=1e-6)

    print("KERNEL_OK")
</pallas_src>

<mosaic_0001>
module attributes {stable_mosaic.version = 11 : i64} {
  func.func @kernel(%arg0: i32, %arg1: i32, %arg2: memref<8x256xf32, #tpu.memory_space<vmem>>, %arg3: memref<8x1xf32, #tpu.memory_space<vmem>>, %arg4: memref<8x256xf32, #tpu.memory_space<vmem>>) attributes {dimension_semantics = [#tpu.dimension_semantics<parallel>, #tpu.dimension_semantics<parallel>], iteration_bounds = array<i64: 1, 1>, scalar_prefetch = 0 : i64, scratch_operands = 0 : i64, tpu.core_type = #tpu.core_type<tc>, window_params = [{transform_indices = @transform_0, window_bounds = array<i64: 8, 256>}, {pipeline_mode = #tpu.pipeline_mode<synchronous>, transform_indices = @transform_1, window_bounds = array<i64: 8, 1>}, {transform_indices = @transform_2, window_bounds = array<i64: 8, 256>}]} {
    %c8_i32 = arith.constant 8 : i32
    %0 = arith.muli %arg0, %c8_i32 : i32
    %1 = tpu.assume_multiple %0, 8 : i32
    %c0 = arith.constant 0 : index
    %c0_0 = arith.constant 0 : index
    %2 = vector.load %arg2[%c0, %c0_0] : memref<8x256xf32, #tpu.memory_space<vmem>>, vector<8x256xf32>
    %3 = arith.index_cast %1 : i32 to index
    %c0_1 = arith.constant 0 : index
    %4 = vector.load %arg3[%3, %c0_1] : memref<8x1xf32, #tpu.memory_space<vmem>>, vector<8x1xf32>
    %5 = vector.broadcast %4 : vector<8x1xf32> to vector<8x256xf32>
    %6 = arith.mulf %2, %5 : vector<8x256xf32>
    %c0_2 = arith.constant 0 : index
    %c0_3 = arith.constant 0 : index
    %7 = vector.load %arg4[%c0_2, %c0_3] : memref<8x256xf32, #tpu.memory_space<vmem>>, vector<8x256xf32>
    tpu.vector_store %arg4[%c0_2, %c0_3], %6 {strides = array<i32>} : memref<8x256xf32, #tpu.memory_space<vmem>>, vector<8x256xf32>,
    return
  }
  func.func @transform_0(%arg0: i32, %arg1: i32) -> (i32, i32) {
    %c0_i32 = arith.constant 0 : i32
    return %arg0, %arg1 : i32, i32
  }
  func.func @transform_1(%arg0: i32, %arg1: i32) -> (i32, i32) {
    %c0_i32 = arith.constant 0 : i32
    %c0_i32_0 = arith.constant 0 : i32
    %c0_i32_1 = arith.constant 0 : i32
    return %c0_i32, %c0_i32_0 : i32, i32
  }
  func.func @transform_2(%arg0: i32, %arg1: i32) -> (i32, i32) {
    %c0_i32 = arith.constant 0 : i32
    return %arg0, %arg1 : i32, i32
  }
}

</mosaic_0001>

<bundles_post_ra>
// kernel: tpu_custom_call.1
= control target key start
LH: loop header
LB: loop body
LE: loop exit
PB: predicated region body
PF: predicated region fallthrough
CT: control target
= control target key end

     0   :  { %7 = vsyncpa [#allocation3], 0  ;;  %s140_s0 = inlined_call_operand.hbm [shape: f32[8,256], index: 0, kind: input, shape index: {}]   ;;  %s141_s1 = inlined_call_operand.vmem [shape: f32[8,1], index: 1, kind: input, shape index: {}]   ;;  %s142_s2 = inlined_call_operand.hbm [shape: f32[8,256], index: 2, kind: output, shape index: {}]  }
   0x1   :  { %8 = vsyncpa [#allocation4], 0  ;;  %s14_s11 = sshll.u32 %s140_s0, 4  ;;  %s113_s12 = smov [#allocation2]   ;;  %s15_s11 = int_to_ptr.hbm [resolvable:$true] %s14_s11 }
   0x2   :  { %s16_s13 = sshll.u32 %s113_s12, 4  ;;  %s17_s13 = int_to_ptr.vmem [resolvable:$true] %s16_s13 }
   0x3   :  { %19 = dma.hbm_to_vmem [thread:$0]  %s15_s11, 256, %s17_s13, [#allocation3]  }
   0x4   :  { %109 = dma.done.wait [#allocation3], 256  }
   0x5   :  { %110 = vsyncadd [#allocation3], 4294967040  ;;  %v114_v0 = vmov 0   ;;  %v30_v1 = vld [vmem:[%s141_s1] sm:$0xff]  ;;  %v28_v3 = vld [vmem:[#allocation2 + $0x8] sm:$0xff]  ;;  %s115_s16 = smov [#allocation5]  }
   0x6   :  { %60 = vset.pattern.permute.xlu0 %v114_v0  ;;  %v27_v2 = vld [vmem:[#allocation2] sm:$0xff]  ;;  %s45_s17 = sshll.u32 %s115_s16, 4  ;;  %s47_s19 = sshll.u32 %s142_s2, 4  ;;  %s46_s17 = int_to_ptr.vmem [resolvable:$true] %s45_s17  ;;  %s48_s19 = int_to_ptr.hbm [resolvable:$true] %s47_s19 }
   0x7   :  { %33 = vperm.xlu0 %60, %v30_v1  }
  0x79   :  { %v34_v4 = vpop.permute.xlu0 %33 }
  0x7a   :  { %v36_v5 = vmul.f32 %v34_v4, %v27_v2  ;;  %v37_v6 = vmul.f32 %v34_v4, %v28_v3 }
  0x7c   :  { %38 = vst [vmem:[#allocation5] sm:$0xff] %v36_v5 }
  0x7d   :  { %39 = vst [vmem:[#allocation5 + $0x8] sm:$0xff] %v37_v6 }
  0x7e   :  { %50 = dma.vmem_to_hbm [thread:$0]  %s46_s17, 256, %s48_s19, [#allocation4]  }
  0x7f   :  { %111 = dma.done.wait [#allocation4], 256  }
  0x80   :  { %112 = vsyncadd [#allocation4], 4294967040 }
  0x81   :  { %55 = vsyncpa [#allocation3], 1 }
  0x82   :  { %56 = vsyncpa [#allocation4], 1 }

</bundles_post_ra>
